<compile_context>
chip_gen: v7x
topology: tpu7x:2x2x1
jax: 0.10.0
libtpu: 0.0.40
codegen_flags: <defaults>
</compile_context>

<pallas_src>
import jax
import jax.numpy as jnp
from jax import lax
from jax.experimental import pallas as pl
from jax.experimental.pallas import tpu as pltpu

# ---------------------------------------------------------------------------
# Model dims (small synthetic config; real net uses IN=128, BASE=256, T=1024)
# ---------------------------------------------------------------------------
IN_FEAT_DIM = 16     # cfg.MODEL.IN_FEAT_DIM
BASE_FEAT_DIM = 32   # cfg.MODEL.BASE_FEAT_DIM
K2 = 9               # conv2 kernel size
PAD2 = 4             # conv2 padding


def base_feature_kernel(x_ref, w1_ref, b1_ref, w2_ref, b2_ref, o_ref, hpad_ref):
    """One batch element per grid step.

    x_ref   : (1, T, Cin)        f32   input slab (NWC)
    w1_ref  : (Cin, Cb)          bf16  conv1 weight (k=1) as a matmul matrix
    b1_ref  : (1, Cb)            f32   conv1 bias
    w2_ref  : (K2, Cb, Cb)       bf16  conv2 weight, w2[k, c_in, c_out]
    b2_ref  : (1, Cb)            f32   conv2 bias
    o_ref   : (1, T//2, Cb)      f32   output slab (NWC)
    hpad_ref: (T + 2*PAD2, Cb)   f32   VMEM scratch: conv1 output + zero halo
    """
    x = x_ref[0]                                   # (T, Cin) f32
    T = x.shape[0]
    cb = w1_ref.shape[1]

    # conv1 (kernel_size=1): pointwise channel matmul. bf16 operands, f32 acc.
    h1 = jnp.dot(x.astype(jnp.bfloat16), w1_ref[...],
                 preferred_element_type=jnp.float32)
    h1 = jnp.maximum(h1 + b1_ref[...], 0.0)        # (T, Cb) f32

    # Stage conv1 output into a zero-padded VMEM scratch; the 4 halo rows at
    # each end provide the conv2 zero padding.  Halo rows are rewritten every
    # step (scratch is per-core, so a "first step only" init is unsafe when
    # the batch axis is megacore-partitioned); this is only 2*(4, Cb) stores.
    hpad_ref[0:PAD2, :] = jnp.zeros((PAD2, cb), jnp.float32)
    hpad_ref[PAD2 + T:PAD2 + T + PAD2, :] = jnp.zeros((PAD2, cb), jnp.float32)
    hpad_ref[PAD2:PAD2 + T, :] = h1

    # conv2 (kernel_size=9, padding=4): accumulate 9 shifted matmuls on the
    # MXU; each tap's LHS is a static window slice of the scratch ref (no
    # concatenated copy is ever materialized as a value).
    acc = jnp.broadcast_to(b2_ref[...], (T, cb)).astype(jnp.float32)
    for k in range(K2):                            # static unrolled taps
        lhs = hpad_ref[k:k + T, :].astype(jnp.bfloat16)      # (T, Cb) bf16
        acc = acc + jnp.dot(lhs, w2_ref[k],
                            preferred_element_type=jnp.float32)

    # maxpool1d(kernel=2, stride=2) along time, then ReLU (max/ReLU commute,
    # so pooling first halves the ReLU work).
    pooled = jnp.max(acc.reshape(T // 2, 2, cb), axis=1)     # (T//2, Cb)
    o_ref[0] = jnp.maximum(pooled, 0.0)


@jax.jit
def base_feature_net(x_ncw, w1, b1, w2, b2):
    """x_ncw: (B, Cin, T) float32  ->  (B, Cb, T//2) float32 (PyTorch NCW)."""
    B, cin, T = x_ncw.shape
    cb = w1.shape[0]

    # TODO(synk): keep activations NWC end-to-end in the surrounding model to
    # eliminate these two full-tensor HBM round trips.
    x_nwc = jnp.transpose(x_ncw, (0, 2, 1))                  # (B, T, Cin)

    # Weights reshaped into matmul-friendly form and pre-cast to bf16 (done
    # once per call; MXU accumulates in f32 inside the kernel).
    w1_m = jnp.transpose(w1[:, :, 0], (1, 0)).astype(jnp.bfloat16)  # (Cin, Cb)
    w2_m = jnp.transpose(w2, (2, 1, 0)).astype(jnp.bfloat16)        # (K2, Cb, Cb)
    b1_m = b1.reshape(1, cb).astype(jnp.float32)
    b2_m = b2.reshape(1, cb).astype(jnp.float32)

    flops = B * (2 * T * cin * cb + 2 * T * cb * cb * K2)
    bytes_accessed = (B * T * cin * 4            # input
                      + cin * cb * 2             # w1 (bf16)
                      + K2 * cb * cb * 2         # w2 (bf16)
                      + 2 * cb * 4               # biases
                      + B * (T // 2) * cb * 4)   # output

    out_nwc = pl.pallas_call(
        base_feature_kernel,
        out_shape=jax.ShapeDtypeStruct((B, T // 2, cb), jnp.float32),
        grid_spec=pltpu.PrefetchScalarGridSpec(
            num_scalar_prefetch=0,
            grid=(B,),
            in_specs=[
                pl.BlockSpec((1, T, cin), lambda b: (b, 0, 0)),
                pl.BlockSpec((cin, cb), lambda b: (0, 0)),
                pl.BlockSpec((1, cb), lambda b: (0, 0)),
                pl.BlockSpec((K2, cb, cb), lambda b: (0, 0, 0)),
                pl.BlockSpec((1, cb), lambda b: (0, 0)),
            ],
            out_specs=pl.BlockSpec((1, T // 2, cb), lambda b: (b, 0, 0)),
            scratch_shapes=[pltpu.VMEM((T + 2 * PAD2, cb), jnp.float32)],
        ),
        compiler_params=pltpu.CompilerParams(
            dimension_semantics=("parallel",)),
        cost_estimate=pl.CostEstimate(
            flops=flops, transcendentals=0, bytes_accessed=bytes_accessed),
    )(x_nwc, w1_m, b1_m, w2_m, b2_m)

    # NWC -> NCW to match the PyTorch module's output convention.
    return jnp.transpose(out_nwc, (0, 2, 1))                 # (B, Cb, T//2)


def reference_forward(x_ncw, w1, b1, w2, b2):
    """Pure-JAX f32 reference mirroring PyTorch Conv1d / MaxPool1d semantics."""
    dn = ('NCH', 'OIH', 'NCH')
    h = lax.conv_general_dilated(x_ncw, w1, window_strides=(1,),
                                 padding=[(0, 0)], dimension_numbers=dn)
    h = jnp.maximum(h + b1[None, :, None], 0.0)
    h = lax.conv_general_dilated(h, w2, window_strides=(1,),
                                 padding=[(PAD2, PAD2)], dimension_numbers=dn)
    h = jnp.maximum(h + b2[None, :, None], 0.0)
    B, C, T = h.shape
    return jnp.max(h.reshape(B, C, T // 2, 2), axis=-1)


if __name__ == "__main__":
    B, T = 2, 64

    key = jax.random.PRNGKey(0)
    kx, k1, k2, k3, k4 = jax.random.split(key, 5)

    x = jax.random.normal(kx, (B, IN_FEAT_DIM, T), dtype=jnp.float32)

    # Deterministic synthetic parameters (PyTorch Conv1d weight layout: (O, I, K)).
    w1 = 0.1 * jax.random.normal(k1, (BASE_FEAT_DIM, IN_FEAT_DIM, 1),
                                 dtype=jnp.float32)
    b1 = 0.05 * jax.random.normal(k2, (BASE_FEAT_DIM,), dtype=jnp.float32)
    w2 = 0.1 * jax.random.normal(k3, (BASE_FEAT_DIM, BASE_FEAT_DIM, K2),
                                 dtype=jnp.float32)
    b2 = 0.05 * jax.random.normal(k4, (BASE_FEAT_DIM,), dtype=jnp.float32)

    out = base_feature_net(x, w1, b1, w2, b2)
    out = jax.block_until_ready(out)

    ref = reference_forward(x, w1, b1, w2, b2)
    assert out.shape == (B, BASE_FEAT_DIM, T // 2), out.shape
    # bf16 matmul operands vs. f32 reference -> loosened tolerance.
    assert jnp.allclose(out, ref, atol=5e-2, rtol=5e-2), float(
        jnp.max(jnp.abs(out - ref)))

    print("KERNEL_OK")
</pallas_src>

<mosaic_0001>
module attributes {stable_mosaic.version = 11 : i64} {
  func.func @base_feature_kernel(%arg0: i32, %arg1: memref<1x64x16xf32, #tpu.memory_space<vmem>>, %arg2: memref<16x32xbf16, #tpu.memory_space<vmem>>, %arg3: memref<1x32xf32, #tpu.memory_space<vmem>>, %arg4: memref<9x32x32xbf16, #tpu.memory_space<vmem>>, %arg5: memref<1x32xf32, #tpu.memory_space<vmem>>, %arg6: memref<1x32x32xf32, #tpu.memory_space<vmem>>, %arg7: memref<72x32xf32, #tpu.memory_space<vmem>>) attributes {dimension_semantics = [#tpu.dimension_semantics<parallel>], iteration_bounds = array<i64: 2>, scalar_prefetch = 0 : i64, scratch_operands = 1 : i64, tpu.core_type = #tpu.core_type<tc>, window_params = [{transform_indices = @transform_0, window_bounds = array<i64: 1, 64, 16>}, {pipeline_mode = #tpu.pipeline_mode<synchronous>, transform_indices = @transform_1, window_bounds = array<i64: 16, 32>}, {pipeline_mode = #tpu.pipeline_mode<synchronous>, transform_indices = @transform_2, window_bounds = array<i64: 1, 32>}, {pipeline_mode = #tpu.pipeline_mode<synchronous>, transform_indices = @transform_3, window_bounds = array<i64: 9, 32, 32>}, {pipeline_mode = #tpu.pipeline_mode<synchronous>, transform_indices = @transform_4, window_bounds = array<i64: 1, 32>}, {transform_indices = @transform_5, window_bounds = array<i64: 1, 32, 32>}]} {
    %c0 = arith.constant 0 : index
    %c0_0 = arith.constant 0 : index
    %c0_1 = arith.constant 0 : index
    %0 = vector.load %arg1[%c0, %c0_0, %c0_1] : memref<1x64x16xf32, #tpu.memory_space<vmem>>, vector<1x64x16xf32>
    %1 = vector.shape_cast %0 : vector<1x64x16xf32> to vector<64x16xf32>
    %2 = arith.truncf %1 : vector<64x16xf32> to vector<64x16xbf16>
    %c0_2 = arith.constant 0 : index
    %c0_3 = arith.constant 0 : index
    %3 = vector.load %arg2[%c0_2, %c0_3] : memref<16x32xbf16, #tpu.memory_space<vmem>>, vector<16x32xbf16>
    %cst = arith.constant dense<0.000000e+00> : vector<64x32xf32>
    %4 = tpu.matmul %2, %3, %cst {dimension_numbers = #tpu.dot_dimension_numbers<[1], [0], [0], [1], [0, 0, 1, 1], [], []>} : vector<64x16xbf16>, vector<16x32xbf16>, vector<64x32xf32> -> vector<64x32xf32>
    %c0_4 = arith.constant 0 : index
    %c0_5 = arith.constant 0 : index
    %5 = vector.load %arg3[%c0_4, %c0_5] : memref<1x32xf32, #tpu.memory_space<vmem>>, vector<1x32xf32>
    %6 = vector.broadcast %5 : vector<1x32xf32> to vector<64x32xf32>
    %7 = arith.addf %4, %6 : vector<64x32xf32>
    %cst_6 = arith.constant 0.000000e+00 : f32
    %8 = vector.broadcast %cst_6 : f32 to vector<64x32xf32>
    %9 = arith.maximumf %7, %8 : vector<64x32xf32>
    %cst_7 = arith.constant 0.000000e+00 : f32
    %10 = vector.broadcast %cst_7 : f32 to vector<4x32xf32>
    %c0_8 = arith.constant 0 : index
    %c0_9 = arith.constant 0 : index
    %11 = vector.load %arg7[%c0_8, %c0_9] : memref<72x32xf32, #tpu.memory_space<vmem>>, vector<4x32xf32>
    tpu.vector_store %arg7[%c0_8, %c0_9], %10 {strides = array<i32>} : memref<72x32xf32, #tpu.memory_space<vmem>>, vector<4x32xf32>,
    %cst_10 = arith.constant 0.000000e+00 : f32
    %12 = vector.broadcast %cst_10 : f32 to vector<4x32xf32>
    %c68 = arith.constant 68 : index
    %c0_11 = arith.constant 0 : index
    %13 = vector.load %arg7[%c68, %c0_11] : memref<72x32xf32, #tpu.memory_space<vmem>>, vector<4x32xf32>
    tpu.vector_store %arg7[%c68, %c0_11], %12 {strides = array<i32>} : memref<72x32xf32, #tpu.memory_space<vmem>>, vector<4x32xf32>,
    %c4 = arith.constant 4 : index
    %c0_12 = arith.constant 0 : index
    %14 = vector.load %arg7[%c4, %c0_12] : memref<72x32xf32, #tpu.memory_space<vmem>>, vector<64x32xf32>
    tpu.vector_store %arg7[%c4, %c0_12], %9 {strides = array<i32>} : memref<72x32xf32, #tpu.memory_space<vmem>>, vector<64x32xf32>,
    %c0_13 = arith.constant 0 : index
    %c0_14 = arith.constant 0 : index
    %15 = vector.load %arg5[%c0_13, %c0_14] : memref<1x32xf32, #tpu.memory_space<vmem>>, vector<1x32xf32>
    %16 = vector.shape_cast %15 : vector<1x32xf32> to vector<1x32xf32>
    %17 = vector.broadcast %16 : vector<1x32xf32> to vector<64x32xf32>
    %c0_15 = arith.constant 0 : index
    %c0_16 = arith.constant 0 : index
    %18 = vector.load %arg7[%c0_15, %c0_16] : memref<72x32xf32, #tpu.memory_space<vmem>>, vector<64x32xf32>
    %19 = arith.truncf %18 : vector<64x32xf32> to vector<64x32xbf16>
    %c0_17 = arith.constant 0 : index
    %c0_18 = arith.constant 0 : index
    %c0_19 = arith.constant 0 : index
    %20 = vector.load %arg4[%c0_17, %c0_18, %c0_19] : memref<9x32x32xbf16, #tpu.memory_space<vmem>>, vector<1x32x32xbf16>
    %21 = vector.shape_cast %20 : vector<1x32x32xbf16> to vector<32x32xbf16>
    %cst_20 = arith.constant dense<0.000000e+00> : vector<64x32xf32>
    %22 = tpu.matmul %19, %21, %cst_20 {dimension_numbers = #tpu.dot_dimension_numbers<[1], [0], [0], [1], [0, 0, 1, 1], [], []>} : vector<64x32xbf16>, vector<32x32xbf16>, vector<64x32xf32> -> vector<64x32xf32>
    %23 = arith.addf %17, %22 : vector<64x32xf32>
    %c1 = arith.constant 1 : index
    %c0_21 = arith.constant 0 : index
    %24 = vector.load %arg7[%c1, %c0_21] : memref<72x32xf32, #tpu.memory_space<vmem>>, vector<64x32xf32>
    %25 = arith.truncf %24 : vector<64x32xf32> to vector<64x32xbf16>
    %c1_22 = arith.constant 1 : index
    %c0_23 = arith.constant 0 : index
    %c0_24 = arith.constant 0 : index
    %26 = vector.load %arg4[%c1_22, %c0_23, %c0_24] : memref<9x32x32xbf16, #tpu.memory_space<vmem>>, vector<1x32x32xbf16>
    %27 = vector.shape_cast %26 : vector<1x32x32xbf16> to vector<32x32xbf16>
    %cst_25 = arith.constant dense<0.000000e+00> : vector<64x32xf32>
    %28 = tpu.matmul %25, %27, %cst_25 {dimension_numbers = #tpu.dot_dimension_numbers<[1], [0], [0], [1], [0, 0, 1, 1], [], []>} : vector<64x32xbf16>, vector<32x32xbf16>, vector<64x32xf32> -> vector<64x32xf32>
    %29 = arith.addf %23, %28 : vector<64x32xf32>
    %c2 = arith.constant 2 : index
    %c0_26 = arith.constant 0 : index
    %30 = vector.load %arg7[%c2, %c0_26] : memref<72x32xf32, #tpu.memory_space<vmem>>, vector<64x32xf32>
    %31 = arith.truncf %30 : vector<64x32xf32> to vector<64x32xbf16>
    %c2_27 = arith.constant 2 : index
    %c0_28 = arith.constant 0 : index
    %c0_29 = arith.constant 0 : index
    %32 = vector.load %arg4[%c2_27, %c0_28, %c0_29] : memref<9x32x32xbf16, #tpu.memory_space<vmem>>, vector<1x32x32xbf16>
    %33 = vector.shape_cast %32 : vector<1x32x32xbf16> to vector<32x32xbf16>
    %cst_30 = arith.constant dense<0.000000e+00> : vector<64x32xf32>
    %34 = tpu.matmul %31, %33, %cst_30 {dimension_numbers = #tpu.dot_dimension_numbers<[1], [0], [0], [1], [0, 0, 1, 1], [], []>} : vector<64x32xbf16>, vector<32x32xbf16>, vector<64x32xf32> -> vector<64x32xf32>
    %35 = arith.addf %29, %34 : vector<64x32xf32>
    %c3 = arith.constant 3 : index
    %c0_31 = arith.constant 0 : index
    %36 = vector.load %arg7[%c3, %c0_31] : memref<72x32xf32, #tpu.memory_space<vmem>>, vector<64x32xf32>
    %37 = arith.truncf %36 : vector<64x32xf32> to vector<64x32xbf16>
    %c3_32 = arith.constant 3 : index
    %c0_33 = arith.constant 0 : index
    %c0_34 = arith.constant 0 : index
    %38 = vector.load %arg4[%c3_32, %c0_33, %c0_34] : memref<9x32x32xbf16, #tpu.memory_space<vmem>>, vector<1x32x32xbf16>
    %39 = vector.shape_cast %38 : vector<1x32x32xbf16> to vector<32x32xbf16>
    %cst_35 = arith.constant dense<0.000000e+00> : vector<64x32xf32>
    %40 = tpu.matmul %37, %39, %cst_35 {dimension_numbers = #tpu.dot_dimension_numbers<[1], [0], [0], [1], [0, 0, 1, 1], [], []>} : vector<64x32xbf16>, vector<32x32xbf16>, vector<64x32xf32> -> vector<64x32xf32>
    %41 = arith.addf %35, %40 : vector<64x32xf32>
    %c4_36 = arith.constant 4 : index
    %c0_37 = arith.constant 0 : index
    %42 = vector.load %arg7[%c4_36, %c0_37] : memref<72x32xf32, #tpu.memory_space<vmem>>, vector<64x32xf32>
    %43 = arith.truncf %42 : vector<64x32xf32> to vector<64x32xbf16>
    %c4_38 = arith.constant 4 : index
    %c0_39 = arith.constant 0 : index
    %c0_40 = arith.constant 0 : index
    %44 = vector.load %arg4[%c4_38, %c0_39, %c0_40] : memref<9x32x32xbf16, #tpu.memory_space<vmem>>, vector<1x32x32xbf16>
    %45 = vector.shape_cast %44 : vector<1x32x32xbf16> to vector<32x32xbf16>
    %cst_41 = arith.constant dense<0.000000e+00> : vector<64x32xf32>
    %46 = tpu.matmul %43, %45, %cst_41 {dimension_numbers = #tpu.dot_dimension_numbers<[1], [0], [0], [1], [0, 0, 1, 1], [], []>} : vector<64x32xbf16>, vector<32x32xbf16>, vector<64x32xf32> -> vector<64x32xf32>
    %47 = arith.addf %41, %46 : vector<64x32xf32>
    %c5 = arith.constant 5 : index
    %c0_42 = arith.constant 0 : index
    %48 = vector.load %arg7[%c5, %c0_42] : memref<72x32xf32, #tpu.memory_space<vmem>>, vector<64x32xf32>
    %49 = arith.truncf %48 : vector<64x32xf32> to vector<64x32xbf16>
    %c5_43 = arith.constant 5 : index
    %c0_44 = arith.constant 0 : index
    %c0_45 = arith.constant 0 : index
    %50 = vector.load %arg4[%c5_43, %c0_44, %c0_45] : memref<9x32x32xbf16, #tpu.memory_space<vmem>>, vector<1x32x32xbf16>
    %51 = vector.shape_cast %50 : vector<1x32x32xbf16> to vector<32x32xbf16>
    %cst_46 = arith.constant dense<0.000000e+00> : vector<64x32xf32>
    %52 = tpu.matmul %49, %51, %cst_46 {dimension_numbers = #tpu.dot_dimension_numbers<[1], [0], [0], [1], [0, 0, 1, 1], [], []>} : vector<64x32xbf16>, vector<32x32xbf16>, vector<64x32xf32> -> vector<64x32xf32>
    %53 = arith.addf %47, %52 : vector<64x32xf32>
    %c6 = arith.constant 6 : index
    %c0_47 = arith.constant 0 : index
    %54 = vector.load %arg7[%c6, %c0_47] : memref<72x32xf32, #tpu.memory_space<vmem>>, vector<64x32xf32>
    %55 = arith.truncf %54 : vector<64x32xf32> to vector<64x32xbf16>
    %c6_48 = arith.constant 6 : index
    %c0_49 = arith.constant 0 : index
    %c0_50 = arith.constant 0 : index
    %56 = vector.load %arg4[%c6_48, %c0_49, %c0_50] : memref<9x32x32xbf16, #tpu.memory_space<vmem>>, vector<1x32x32xbf16>
    %57 = vector.shape_cast %56 : vector<1x32x32xbf16> to vector<32x32xbf16>
    %cst_51 = arith.constant dense<0.000000e+00> : vector<64x32xf32>
    %58 = tpu.matmul %55, %57, %cst_51 {dimension_numbers = #tpu.dot_dimension_numbers<[1], [0], [0], [1], [0, 0, 1, 1], [], []>} : vector<64x32xbf16>, vector<32x32xbf16>, vector<64x32xf32> -> vector<64x32xf32>
    %59 = arith.addf %53, %58 : vector<64x32xf32>
    %c7 = arith.constant 7 : index
    %c0_52 = arith.constant 0 : index
    %60 = vector.load %arg7[%c7, %c0_52] : memref<72x32xf32, #tpu.memory_space<vmem>>, vector<64x32xf32>
    %61 = arith.truncf %60 : vector<64x32xf32> to vector<64x32xbf16>
    %c7_53 = arith.constant 7 : index
    %c0_54 = arith.constant 0 : index
    %c0_55 = arith.constant 0 : index
    %62 = vector.load %arg4[%c7_53, %c0_54, %c0_55] : memref<9x32x32xbf16, #tpu.memory_space<vmem>>, vector<1x32x32xbf16>
    %63 = vector.shape_cast %62 : vector<1x32x32xbf16> to vector<32x32xbf16>
    %cst_56 = arith.constant dense<0.000000e+00> : vector<64x32xf32>
    %64 = tpu.matmul %61, %63, %cst_56 {dimension_numbers = #tpu.dot_dimension_numbers<[1], [0], [0], [1], [0, 0, 1, 1], [], []>} : vector<64x32xbf16>, vector<32x32xbf16>, vector<64x32xf32> -> vector<64x32xf32>
    %65 = arith.addf %59, %64 : vector<64x32xf32>
    %c8 = arith.constant 8 : index
    %c0_57 = arith.constant 0 : index
    %66 = vector.load %arg7[%c8, %c0_57] : memref<72x32xf32, #tpu.memory_space<vmem>>, vector<64x32xf32>
    %67 = arith.truncf %66 : vector<64x32xf32> to vector<64x32xbf16>
    %c8_58 = arith.constant 8 : index
    %c0_59 = arith.constant 0 : index
    %c0_60 = arith.constant 0 : index
    %68 = vector.load %arg4[%c8_58, %c0_59, %c0_60] : memref<9x32x32xbf16, #tpu.memory_space<vmem>>, vector<1x32x32xbf16>
    %69 = vector.shape_cast %68 : vector<1x32x32xbf16> to vector<32x32xbf16>
    %cst_61 = arith.constant dense<0.000000e+00> : vector<64x32xf32>
    %70 = tpu.matmul %67, %69, %cst_61 {dimension_numbers = #tpu.dot_dimension_numbers<[1], [0], [0], [1], [0, 0, 1, 1], [], []>} : vector<64x32xbf16>, vector<32x32xbf16>, vector<64x32xf32> -> vector<64x32xf32>
    %71 = arith.addf %65, %70 : vector<64x32xf32>
    %72 = vector.shape_cast %71 : vector<64x32xf32> to vector<32x2x32xf32>
    %cst_62 = arith.constant dense<0xFF800000> : vector<32x32xf32>
    %73 = vector.multi_reduction <maximumf>, %72, %cst_62 [1] : vector<32x2x32xf32> to vector<32x32xf32>
    %cst_63 = arith.constant 0.000000e+00 : f32
    %74 = vector.broadcast %cst_63 : f32 to vector<32x32xf32>
    %75 = arith.maximumf %73, %74 : vector<32x32xf32>
    %c0_64 = arith.constant 0 : index
    %c0_65 = arith.constant 0 : index
    %c0_66 = arith.constant 0 : index
    %76 = vector.load %arg6[%c0_64, %c0_65, %c0_66] : memref<1x32x32xf32, #tpu.memory_space<vmem>>, vector<1x32x32xf32>
    %77 = vector.shape_cast %76 : vector<1x32x32xf32> to vector<32x32xf32>
    %78 = vector.shape_cast %75 : vector<32x32xf32> to vector<1x32x32xf32>
    tpu.vector_store %arg6[%c0_64, %c0_65, %c0_66], %78 {strides = array<i32>} : memref<1x32x32xf32, #tpu.memory_space<vmem>>, vector<1x32x32xf32>,
    return
  }
  func.func @transform_0(%arg0: i32) -> (i32, i32, i32) {
    %c0_i32 = arith.constant 0 : i32
    %c0_i32_0 = arith.constant 0 : i32
    %c0_i32_1 = arith.constant 0 : i32
    return %arg0, %c0_i32, %c0_i32_0 : i32, i32, i32
  }
  func.func @transform_1(%arg0: i32) -> (i32, i32) {
    %c0_i32 = arith.constant 0 : i32
    %c0_i32_0 = arith.constant 0 : i32
    %c0_i32_1 = arith.constant 0 : i32
    return %c0_i32, %c0_i32_0 : i32, i32
  }
  func.func @transform_2(%arg0: i32) -> (i32, i32) {
    %c0_i32 = arith.constant 0 : i32
    %c0_i32_0 = arith.constant 0 : i32
    %c0_i32_1 = arith.constant 0 : i32
    return %c0_i32, %c0_i32_0 : i32, i32
  }
  func.func @transform_3(%arg0: i32) -> (i32, i32, i32) {
    %c0_i32 = arith.constant 0 : i32
    %c0_i32_0 = arith.constant 0 : i32
    %c0_i32_1 = arith.constant 0 : i32
    %c0_i32_2 = arith.constant 0 : i32
    return %c0_i32, %c0_i32_0, %c0_i32_1 : i32, i32, i32
  }
  func.func @transform_4(%arg0: i32) -> (i32, i32) {
    %c0_i32 = arith.constant 0 : i32
    %c0_i32_0 = arith.constant 0 : i32
    %c0_i32_1 = arith.constant 0 : i32
    return %c0_i32, %c0_i32_0 : i32, i32
  }
  func.func @transform_5(%arg0: i32) -> (i32, i32, i32) {
    %c0_i32 = arith.constant 0 : i32
    %c0_i32_0 = arith.constant 0 : i32
    %c0_i32_1 = arith.constant 0 : i32
    return %arg0, %c0_i32, %c0_i32_0 : i32, i32, i32
  }
}

</mosaic_0001>

<bundles_post_ra>
// kernel: base_feature_net.1
= control target key start
LH: loop header
LB: loop body
LE: loop exit
PB: predicated region body
PF: predicated region fallthrough
CT: control target
= control target key end

     0   :  { %s2370_s18 = smov 0   ;;  %s2664_s0 = inlined_call_operand.vmem [shape: f32[2,64,16], index: 0, kind: input, shape index: {}]   ;;  %s2665_s1 = inlined_call_operand.vmem [shape: bf16[16,32], index: 1, kind: input, shape index: {}]   ;;  %s2666_s2 = inlined_call_operand.vmem [shape: f32[1,32], index: 2, kind: input, shape index: {}]   ;;  %s2667_s3 = inlined_call_operand.vmem [shape: bf16[9,32,32], index: 3, kind: input, shape index: {}]   ;;  %s2668_s4 = inlined_call_operand.vmem [shape: f32[1,32], index: 4, kind: input, shape index: {}]   ;;  %s2669_s5 = inlined_call_operand.vmem [shape: f32[2,32,32], index: 5, kind: output, shape index: {}]  }
   0x1 LB: > { %s1946_s19 = sadd.s32 4294967295, %s2336_s18   ;;  %p1950_p0 = scmp.ge.s32.totalorder %s2336_s18, 1  ;;  %s2336_s18 = sphi %s2370_s18, %s15_s18  }
   0x2   : > { %p187_p1 = scmp.lt.s32.totalorder %s2336_s18, 3 }
   0x4   : > { %p188_p2 = pnand %p1950_p0, %p187_p1 }
   0x5   : > { %v2311_v0 = vld [vmem:[%s2665_s1] sm:$0xff] (!%p188_p2)   ;;  %p215_p3 = scmp.lt.s32.totalorder (!%p188_p2), %s1946_s19, 1  ;;  %vm253_vm0 = vcmask (!%p188_p2), 130048   ;;  %vm339_vm1 = vcmask (!%p188_p2), 257024   ;;  %v2338_v13 = vmov (!%p188_p2), 0.0   ;;  %v2314_v16 = vld [vmem:[%s2667_s3 + $0x48] sm:$0xff] (!%p188_p2)  }
   0x6   : > { %191 = sbr.rel (%p188_p2) target bundleno = 621 (0x26d), region = 40  ;;  %2111 = vmatprep.subr.bf16.mxu0 (!%p188_p2), %v2311_v0  ;;  %340 = vst.msk [vmem:[#allocation2] sm:$0xf] (!%p188_p2), %vm339_vm1, %v2338_v13  ;;  %341 = vst.msk [vmem:[#allocation2 + $0x44] sm:$0xf] (!%p188_p2), %vm339_vm1, %v2338_v13  ;;  %v2312_v14 = vld [vmem:[%s2667_s3 + $0x40] sm:$0xff] (!%p188_p2)  }
   0x7   : > { %2112 = vmatpush3.bf16.msra.mxu0 (!%p188_p2), %v2311_v0  ;;  %v2313_v15 = vld [vmem:[%s2667_s3] sm:$0xff] (!%p188_p2)   ;;  %2169 = vmatprep.subr.bf16.mxu1 (!%p188_p2), %v2312_v14  ;;  %v2315_v17 = vld [vmem:[%s2667_s3 + $0x8] sm:$0xff] (!%p188_p2)   ;;  %v2316_v18 = vld [vmem:[%s2667_s3 + $0x50] sm:$0xff] (!%p188_p2)   ;;  %vm342_vm2 = vcmask (!%p188_p2), 261120   ;;  %vm1559_vm3 = vcmask (!%p188_p2), 254976   ;;  %vm1848_vm4 = vcmask (!%p188_p2), 1041409  }
   0x8   : > { %2121 = vmatprep.subr.bf16.mxu0 (!%p188_p2), %v2313_v15  ;;  %2170 = vmatpush3.bf16.msra.mxu1 (!%p188_p2), %v2312_v14  ;;  %v2318_v19 = vld [vmem:[%s2667_s3 + $0x10] sm:$0xff] (!%p188_p2)   ;;  %v1955_v20 = vld [vmem:[%s2666_s2] ss:$0 sm:$0xff] (!%p188_p2)  ;;  %v2317_v57 = vld [vmem:[%s2667_s3 + $0x58] sm:$0xff] (!%p188_p2)   ;;  %vm1850_vm5 = vcmask (!%p188_p2), 1042434   ;;  %vm1852_vm6 = vcmask (!%p188_p2), 1043459  }
   0x9   : > { %2171 = vmatprep.subr.bf16.mxu1 (!%p188_p2), %v2314_v16  ;;  %v2319_v58 = vld [vmem:[%s2667_s3 + $0x18] sm:$0xff] (!%p188_p2)   ;;  %v2320_v59 = vld [vmem:[%s2667_s3 + $0x60] sm:$0xff] (!%p188_p2)   ;;  %vm1854_vm7 = vcmask (!%p188_p2), 1044484   ;;  %vm1856_vm8 = vcmask (!%p188_p2), 1045509   ;;  %vm1858_vm9 = vcmask (!%p188_p2), 1046534   ;;  %vm1860_vm10 = vcmask (!%p188_p2), 1047559  }
   0xa   : > { %v2322_v60 = vld [vmem:[%s2667_s3 + $0x20] sm:$0xff] (!%p188_p2)  }
   0xc   : > { %2172 = vmatpush3.bf16.msra.mxu1 (!%p188_p2), %v2314_v16 }
   0xd   : > { %s2671_s19 = smov (!%p215_p3, %s1946_s19), 1  ;;  %2181 = vmatprep.subr.bf16.mxu1 %v2316_v18 }
   0xe   : > { %s2050_s22 = sshll.u32 %s2671_s19, 6  ;;  %s2051_s20 = sshll.u32 %s2671_s19, 5 }
   0xf   : > { %s219_s25 = scalar_lea.vmem %s2664_s0, %s2050_s22  ;;  %s2598_s23 = scalar_lea.vmem %s2669_s5, %s2051_s20 }
  0x10   : > { %v226_v1 = vld [vmem:[%s219_s25] sm:$0xff]  ;;  %v227_v2 = vld [vmem:[%s219_s25 + $0x8] sm:$0xff]  ;;  %v228_v3 = vld [vmem:[%s219_s25 + $0x10] sm:$0xff] }
  0x11   : > { %v234_v4 = vpack.c.bf16 %v227_v2, %v226_v1  ;;  %v229_v5 = vld [vmem:[%s219_s25 + $0x18] sm:$0xff]  ;;  %v230_v6 = vld [vmem:[%s219_s25 + $0x20] sm:$0xff]  ;;  %v231_v7 = vld [vmem:[%s219_s25 + $0x28] sm:$0xff] }
  0x12   : > { %v235_v8 = vpack.c.bf16 %v229_v5, %v228_v3  ;;  %v236_v9 = vpack.c.bf16 %v231_v7, %v230_v6  ;;  %v232_v10 = vld [vmem:[%s219_s25 + $0x30] sm:$0xff]  ;;  %v233_v11 = vld [vmem:[%s219_s25 + $0x38] sm:$0xff] }
  0x13   : > { %2113 = vmatprep.mubr.msk.bf16.mxu0 %vm253_vm0, %v234_v4  ;;  %v237_v12 = vpack.c.bf16 %v233_v11, %v232_v10 }
  0x14   : > { %2114 = vmatmul.mubr.msk.bf16.vlgmr.msra.gmra.mrb[0].mxu0 %vm253_vm0, %v235_v8 }
  0x15   : > { %2117 = vmatprep.mubr.msk.bf16.mxu0 %vm253_vm0, %v236_v9  ;;  %2122 = vmatpush3.bf16.msra.mxu0 %v2313_v15 }
  0x16   : > { %2123 = vmatprep.subr.bf16.mxu0 %v2315_v17 }
  0x19   : > { %2124 = vmatpush3.bf16.msra.mxu0 %v2315_v17 }
  0x1a   : > { %2133 = vmatprep.subr.bf16.mxu0 %v2318_v19 }
  0x1c   : > { %2118 = vmatmul.mubr.msk.bf16.gmra.mrb[4].mxu0 %vm253_vm0, %v237_v12 }
  0xe7   : > { %v2115_v21 = vpop.f32.mrb[0].mxu0 }
  0xe8   : > { %v309_v22 = vadd.f32 %v2115_v21, %v1955_v20  ;;  %v300_v23 = vpop.f32.mrb[1].mxu0 }
  0xe9   : > { %v301_v24 = vadd.f32 %v1955_v20, %v300_v23  ;;  %v2116_v25 = vpop.f32.mrb[2].mxu0 }
  0xea   : > { %v333_v26 = vmax.f32 %v309_v22, 0.0  ;;  %v312_v27 = vadd.f32 %v2116_v25, %v1955_v20  ;;  %v303_v28 = vpop.f32.mrb[3].mxu0  ;;  %v2321_v25 = vld [vmem:[%s2667_s3 + $0x68] sm:$0xff]  }
  0xeb   : > { %v331_v29 = vmax.f32 %v301_v24, 0.0  ;;  %v304_v30 = vadd.f32 %v1955_v20, %v303_v28  ;;  %v2323_v28 = vld [vmem:[%s2667_s3 + $0x28] sm:$0xff]  }
  0xec   : > { %345 = vst.msk [vmem:[#allocation2 + $0x14] sm:$0xff] %vm342_vm2, %v333_v26  ;;  %v334_v31 = vmax.f32 %v312_v27, 0.0 }
  0xed   : > { %343 = vst.msk [vmem:[#allocation2 + $0x4] sm:$0xff] %vm342_vm2, %v331_v29  ;;  %v332_v32 = vmax.f32 %v304_v30, 0.0  ;;  %v2324_v30 = vld [vmem:[%s2667_s3 + $0x70] sm:$0xff]  }
  0xee   : > { %346 = vst.msk [vmem:[#allocation2 + $0x1c] sm:$0xff] %vm342_vm2, %v334_v31 }
  0xef   : > { %344 = vst.msk [vmem:[#allocation2 + $0xc] sm:$0xff] %vm342_vm2, %v332_v32  ;;  %v2119_v33 = vpop.f32.mrb[4].mxu0 }
  0xf0   : > { %v325_v34 = vadd.f32 %v2119_v33, %v1955_v20  ;;  %v316_v35 = vpop.f32.mrb[5].mxu0 }
  0xf1   : > { %v317_v36 = vadd.f32 %v1955_v20, %v316_v35  ;;  %v2120_v37 = vpop.f32.mrb[6].mxu0 }
  0xf2   : > { %v337_v38 = vmax.f32 %v325_v34, 0.0  ;;  %v328_v39 = vadd.f32 %v2120_v37, %v1955_v20  ;;  %v319_v40 = vpop.f32.mrb[7].mxu0 }
  0xf3   : > { %v335_v41 = vmax.f32 %v317_v36, 0.0  ;;  %v320_v42 = vadd.f32 %v1955_v20, %v319_v40  ;;  %v815_v55 = vld [vmem:[#allocation2 + $0x14] sm:$0xff] }
  0xf4   : > { %349 = vst.msk [vmem:[#allocation2 + $0x34] sm:$0xff] %vm342_vm2, %v337_v38  ;;  %v338_v43 = vmax.f32 %v328_v39, 0.0  ;;  %v358_v44 = vld [vmem:[#allocation2] sm:$0xff]  ;;  %v2326_v40 = vld [vmem:[%s2667_s3 + $0x30] sm:$0xff]  }
  0xf5   : > { %347 = vst.msk [vmem:[#allocation2 + $0x24] sm:$0xff] %vm342_vm2, %v335_v41  ;;  %v336_v45 = vmax.f32 %v320_v42, 0.0  ;;  %v813_v46 = vld [vmem:[#allocation2 + $0x4] sm:$0xff]  ;;  %v2414_v47 = vld [vmem:[#allocation2 + $0x18] sm:$0xff] }
  0xf6   : > { %v816_v48 = vld [vmem:[#allocation2 + $0x1c] sm:$0xff]  ;;  %350 = vst.msk [vmem:[#allocation2 + $0x3c] sm:$0xff] %vm342_vm2, %v338_v43  ;;  %v2417_v49 = vld [vmem:[#allocation2 + $0x8] sm:$0xff]  ;;  %v2419_v51 = vld [vmem:[#allocation2 + $0x10] sm:$0xff] }
  0xf7   : > { %v814_v50 = vld [vmem:[#allocation2 + $0xc] sm:$0xff]  ;;  %348 = vst.msk [vmem:[#allocation2 + $0x2c] sm:$0xff] %vm342_vm2, %v336_v45  ;;  %v366_v52 = vpack.c.bf16 %v2417_v49, %v358_v44  ;;  %v367_v54 = vpack.c.bf16 %v2414_v47, %v2419_v51  ;;  %v822_v56 = vpack.c.bf16 %v816_v48, %v815_v55  ;;  %v471_v12 = vld [vmem:[#allocation2 + $0x1] sm:$0xff]  ;;  %v474_v16 = vld [vmem:[#allocation2 + $0x19] sm:$0xff] }
  0xf8   : > { %v821_v53 = vpack.c.bf16 %v814_v50, %v813_v46  ;;  %v472_v62 = vld [vmem:[#allocation2 + $0x9] sm:$0xff]  ;;  %v473_v15 = vld [vmem:[#allocation2 + $0x11] sm:$0xff]  ;;  %v588_v44 = vld [vmem:[#allocation2 + $0x1a] sm:$0xff] }
  0xf9   : > { %2125 = vmatprep.mubr.msk.bf16.mxu0 %vm342_vm2, %v366_v52  ;;  %v927_v63 = vld [vmem:[#allocation2 + $0x5] sm:$0xff]  ;;  %v928_v0 = vld [vmem:[#allocation2 + $0xd] sm:$0xff]  ;;  %v479_v13 = vpack.c.bf16 %v472_v62, %v471_v12  ;;  %v480_v22 = vpack.c.bf16 %v474_v16, %v473_v15  ;;  %v1043_v48 = vld [vmem:[#allocation2 + $0x16] sm:$0xff] }
  0xfa   : > { %2173 = vmatprep.mubr.msk.bf16.mxu1 %vm342_vm2, %v821_v53  ;;  %2126 = vmatmul.mubr.msk.bf16.vlgmr.msra.gmra.mrb[8].mxu0 %vm342_vm2, %v367_v54  ;;  %v935_v14 = vpack.c.bf16 %v928_v0, %v927_v63  ;;  %v586_v34 = vld [vmem:[#allocation2 + $0xa] sm:$0xff]  ;;  %v585_v39 = vld [vmem:[#allocation2 + $0x2] sm:$0xff]  ;;  %v587_v43 = vld [vmem:[#allocation2 + $0x12] sm:$0xff] }
  0xfb   : > { %2174 = vmatmul.mubr.msk.bf16.vlgmr.msra.gmra.mrb[0].mxu1 %vm342_vm2, %v822_v56  ;;  %2134 = vmatpush3.bf16.msra.mxu0 %v2318_v19  ;;  %v819_v10 = vld [vmem:[#allocation2 + $0x34] sm:$0xff]  ;;  %v1041_v35 = vld [vmem:[#allocation2 + $0x6] sm:$0xff]  ;;  %v593_v41 = vpack.c.bf16 %v586_v34, %v585_v39  ;;  %v594_v53 = vpack.c.bf16 %v588_v44, %v587_v43  ;;  %v2339_v39 = vmov 1983009808  }
  0xfc   : > { %2182 = vmatpush3.bf16.msra.mxu1 %v2316_v18  ;;  %v2441_v61 = vld [vmem:[#allocation2 + $0x20] sm:$0xff]  ;;  %2135 = vmatprep.subr.bf16.mxu0 %v2319_v58  ;;  %v929_v19 = vld [vmem:[#allocation2 + $0x15] sm:$0xff] }
  0xfd   : > { %2183 = vmatprep.subr.bf16.mxu1 %v2317_v57  ;;  %v817_v1 = vld [vmem:[#allocation2 + $0x24] sm:$0xff]  ;;  %v2443_v2 = vld [vmem:[#allocation2 + $0x38] sm:$0xff]  ;;  %v1042_v36 = vld [vmem:[#allocation2 + $0xe] sm:$0xff] }
  0xfe   : > { %v820_v3 = vld [vmem:[#allocation2 + $0x3c] sm:$0xff]  ;;  %v2445_v4 = vld [vmem:[#allocation2 + $0x28] sm:$0xff]  ;;  %v2447_v6 = vld [vmem:[#allocation2 + $0x30] sm:$0xff]  ;;  %v1049_v42 = vpack.c.bf16 %v1042_v36, %v1041_v35 }
  0xff   : > { %v818_v5 = vld [vmem:[#allocation2 + $0x2c] sm:$0xff]  ;;  %v368_v7 = vpack.c.bf16 %v2445_v4, %v2441_v61  ;;  %v369_v9 = vpack.c.bf16 %v2443_v2, %v2447_v6  ;;  %2136 = vmatpush3.bf16.msra.mxu0 %v2319_v58  ;;  %v824_v11 = vpack.c.bf16 %v820_v3, %v819_v10  ;;  %v930_v17 = vld [vmem:[#allocation2 + $0x1d] sm:$0xff]  ;;  %v933_v32 = vld [vmem:[#allocation2 + $0x35] sm:$0xff]  ;;  %v1279_v34 = vpack.c.bf16 %v2447_v6, %v2445_v4 }
 0x100   : > { %v823_v8 = vpack.c.bf16 %v818_v5, %v817_v1  ;;  %2184 = vmatpush3.bf16.msra.mxu1 %v2317_v57  ;;  %2145 = vmatprep.subr.bf16.mxu0 %v2322_v60  ;;  %v476_v18 = vld [vmem:[#allocation2 + $0x29] sm:$0xff]  ;;  %v936_v23 = vpack.c.bf16 %v930_v17, %v929_v19  ;;  %v475_v24 = vld [vmem:[#allocation2 + $0x21] sm:$0xff]  ;;  %v477_v29 = vld [vmem:[#allocation2 + $0x31] sm:$0xff] }
 0x101   : > { %2193 = vmatprep.subr.bf16.mxu1 %v2320_v59  ;;  %2129 = vmatprep.mubr.msk.bf16.mxu0 %vm342_vm2, %v368_v7  ;;  %v931_v20 = vld [vmem:[#allocation2 + $0x25] sm:$0xff]  ;;  %v932_v21 = vld [vmem:[#allocation2 + $0x2d] sm:$0xff]  ;;  %v481_v26 = vpack.c.bf16 %v476_v18, %v475_v24  ;;  %v478_v31 = vld [vmem:[#allocation2 + $0x39] sm:$0xff] }
 0x102   : > { %2177 = vmatprep.mubr.msk.bf16.mxu1 %vm342_vm2, %v823_v8  ;;  %2130 = vmatmul.mubr.msk.bf16.gmra.mrb[12].mxu0 %vm342_vm2, %v369_v9  ;;  %v937_v27 = vpack.c.bf16 %v932_v21, %v931_v20  ;;  %v934_v33 = vld [vmem:[#allocation2 + $0x3d] sm:$0xff]  ;;  %v482_v37 = vpack.c.bf16 %v478_v31, %v477_v29  ;;  %v590_v46 = vld [vmem:[#allocation2 + $0x2a] sm:$0xff] }
 0x103   : > { %2178 = vmatmul.mubr.msk.bf16.gmra.mrb[4].mxu1 %vm342_vm2, %v824_v11  ;;  %2137 = vmatprep.mubr.msk.bf16.mxu0 %vm342_vm2, %v479_v13  ;;  %v938_v38 = vpack.c.bf16 %v934_v33, %v933_v32  ;;  %v1044_v45 = vld [vmem:[#allocation2 + $0x1e] sm:$0xff]  ;;  %v1045_v50 = vld [vmem:[#allocation2 + $0x26] sm:$0xff]  ;;  %v1046_v52 = vld [vmem:[#allocation2 + $0x2e] sm:$0xff]  ;;  %v1277_v32 = vpack.c.bf16 %v2419_v51, %v2417_v49  ;;  %v1278_v33 = vpack.c.bf16 %v2441_v61, %v2414_v47 }
 0x104   : > { %2185 = vmatprep.mubr.msk.bf16.mxu1 %vm342_vm2, %v935_v14  ;;  %v1050_v54 = vpack.c.bf16 %v1044_v45, %v1043_v48  ;;  %v589_v55 = vld [vmem:[#allocation2 + $0x22] sm:$0xff]  ;;  %v2325_v56 = vld [vmem:[%s2667_s3 + $0x78] sm:$0xff]   ;;  %v1051_v58 = vpack.c.bf16 %v1046_v52, %v1045_v50  ;;  %v700_v3 = vld [vmem:[#allocation2 + $0xb] sm:$0xff] }
 0x105   : > { %v595_v57 = vpack.c.bf16 %v590_v46, %v589_v55  ;;  %v2328_v62 = vld [vmem:[%s2667_s3 + $0x80] sm:$0xff]   ;;  %v1047_v0 = vld [vmem:[#allocation2 + $0x36] sm:$0xff]  ;;  %v704_v16 = vld [vmem:[#allocation2 + $0x2b] sm:$0xff] }
 0x106   : > { %v592_v63 = vld [vmem:[#allocation2 + $0x3a] sm:$0xff]  ;;  %v1155_v5 = vld [vmem:[#allocation2 + $0x7] sm:$0xff]  ;;  %v1156_v7 = vld [vmem:[#allocation2 + $0xf] sm:$0xff] }
 0x107   : > { %v1048_v1 = vld [vmem:[#allocation2 + $0x3e] sm:$0xff]  ;;  %v1163_v12 = vpack.c.bf16 %v1156_v7, %v1155_v5  ;;  %v701_v13 = vld [vmem:[#allocation2 + $0x13] sm:$0xff]  ;;  %v1159_v18 = vld [vmem:[#allocation2 + $0x27] sm:$0xff] }
 0x108   : > { %v1052_v9 = vpack.c.bf16 %v1048_v1, %v1047_v0  ;;  %v699_v10 = vld [vmem:[#allocation2 + $0x3] sm:$0xff]  ;;  %v702_v14 = vld [vmem:[#allocation2 + $0x1b] sm:$0xff]  ;;  %v1160_v19 = vld [vmem:[#allocation2 + $0x2f] sm:$0xff] }
 0x109   : > { %v707_v11 = vpack.c.bf16 %v700_v3, %v699_v10  ;;  %v1158_v15 = vld [vmem:[#allocation2 + $0x1f] sm:$0xff]  ;;  %v1157_v17 = vld [vmem:[#allocation2 + $0x17] sm:$0xff]  ;;  %v708_v20 = vpack.c.bf16 %v702_v14, %v701_v13 }
 0x10a   : > { %2138 = vmatmul.mubr.msk.bf16.vlgmr.msra.gmra.mrb[8].mxu0 %vm342_vm2, %v480_v22  ;;  %v1164_v21 = vpack.c.bf16 %v1158_v15, %v1157_v17  ;;  %v703_v22 = vld [vmem:[#allocation2 + $0x23] sm:$0xff] }
 0x10b   : > { %2186 = vmatmul.mubr.msk.bf16.vlgmr.msra.gmra.mrb[0].mxu1 %vm342_vm2, %v936_v23  ;;  %2141 = vmatprep.mubr.msk.bf16.mxu0 %vm342_vm2, %v481_v26  ;;  %v2329_v23 = vld [vmem:[%s2667_s3 + $0x88] sm:$0xff]   ;;  %v709_v24 = vpack.c.bf16 %v704_v16, %v703_v22  ;;  %v705_v26 = vld [vmem:[#allocation2 + $0x33] sm:$0xff]  ;;  %v1162_v29 = vld [vmem:[#allocation2 + $0x3f] sm:$0xff] }
 0x10c   : > { %2194 = vmatpush3.bf16.msra.mxu1 %v2320_v59  ;;  %2189 = vmatprep.mubr.msk.bf16.mxu1 %vm342_vm2, %v937_v27  ;;  %v2327_v59 = vld [vmem:[%s2667_s3 + $0x38] sm:$0xff]   ;;  %v1276_v35 = vld [vmem:[#allocation2 + $0x40] sm:$0xff] }
 0x10d   : > { %2195 = vmatprep.subr.bf16.mxu1 %v2321_v25  ;;  %2146 = vmatpush3.bf16.msra.mxu0 %v2322_v60  ;;  %v591_v60 = vld [vmem:[#allocation2 + $0x32] sm:$0xff]  ;;  %v706_v27 = vld [vmem:[#allocation2 + $0x3b] sm:$0xff]  ;;  %v1280_v36 = vpack.c.bf16 %v1276_v35, %v2443_v2 }
 0x10e   : > { %2147 = vmatprep.subr.bf16.mxu0 %v2323_v28  ;;  %v596_v8 = vpack.c.bf16 %v592_v63, %v591_v60  ;;  %v2521_v2 = vld [vmem:[%s2668_s4] ss:$0 sm:$0xff] }
 0x110   : > { %2196 = vmatpush3.bf16.msra.mxu1 %v2321_v25  ;;  %v1165_v25 = vpack.c.bf16 %v1160_v19, %v1159_v18 }
 0x111   : > { %2205 = vmatprep.subr.bf16.mxu1 %v2324_v30  ;;  %2148 = vmatpush3.bf16.msra.mxu0 %v2323_v28  ;;  %v1161_v28 = vld [vmem:[#allocation2 + $0x37] sm:$0xff] }
 0x112   : > { %2142 = vmatmul.mubr.msk.bf16.gmra.mrb[12].mxu0 %vm342_vm2, %v482_v37  ;;  %2157 = vmatprep.subr.bf16.mxu0 %v2326_v40  ;;  %v1166_v31 = vpack.c.bf16 %v1162_v29, %v1161_v28 }
 0x113   : > { %2190 = vmatmul.mubr.msk.bf16.gmra.mrb[4].mxu1 %vm342_vm2, %v938_v38  ;;  %2149 = vmatprep.mubr.msk.bf16.mxu0 %vm342_vm2, %v593_v41  ;;  %v1395_v41 = vlaneseq }
 0x114   : > { %2197 = vmatprep.mubr.msk.bf16.mxu1 %vm342_vm2, %v1049_v42 }
 0x115   : > { %v1396_v43 = vshrl.u32 %v1395_v41, 7 }
 0x11a   : > { %2150 = vmatmul.mubr.msk.bf16.vlgmr.msra.gmra.mrb[8].mxu0 %vm342_vm2, %v594_v53 }
 0x11b   : > { %2198 = vmatmul.mubr.msk.bf16.vlgmr.msra.gmra.mrb[0].mxu1 %vm342_vm2, %v1050_v54  ;;  %2153 = vmatprep.mubr.msk.bf16.mxu0 %vm342_vm2, %v595_v57 }
 0x11c   : > { %2206 = vmatpush3.bf16.msra.mxu1 %v2324_v30  ;;  %2201 = vmatprep.mubr.msk.bf16.mxu1 %vm342_vm2, %v1051_v58  ;;  %v710_v30 = vpack.c.bf16 %v706_v27, %v705_v26 }
 0x11d   : > { %2207 = vmatprep.subr.bf16.mxu1 %v2325_v56  ;;  %2158 = vmatpush3.bf16.msra.mxu0 %v2326_v40  ;;  %v1393_v40 = vunpack.c.l.s4 %v2339_v39 }
 0x11e   : > { %2159 = vmatprep.subr.bf16.mxu0 %v2327_v59 }
 0x11f   : > { %v1394_v6 = vunpack.c.0.s8 %v1393_v40 }
 0x120   : > { %2208 = vmatpush3.bf16.msra.mxu1 %v2325_v56 }
 0x121   : > { %2217 = vmatprep.subr.bf16.mxu1 %v2328_v62  ;;  %2160 = vmatpush3.bf16.msra.mxu0 %v2327_v59  ;;  %v2524_v45 = vsub.s32 %v1394_v6, %v1396_v43 }
 0x122   : > { %2154 = vmatmul.mubr.msk.bf16.gmra.mrb[12].mxu0 %vm342_vm2, %v596_v8 }
 0x123   : > { %2202 = vmatmul.mubr.msk.bf16.gmra.mrb[4].mxu1 %vm342_vm2, %v1052_v9  ;;  %2161 = vmatprep.mubr.msk.bf16.mxu0 %vm342_vm2, %v707_v11 }
 0x124   : > { %2209 = vmatprep.mubr.msk.bf16.mxu1 %vm342_vm2, %v1163_v12 }
 0x12a   : > { %2162 = vmatmul.mubr.msk.bf16.vlgmr.msra.gmra.mrb[8].mxu0 %vm342_vm2, %v708_v20 }
 0x12b   : > { %2210 = vmatmul.mubr.msk.bf16.vlgmr.msra.gmra.mrb[0].mxu1 %vm342_vm2, %v1164_v21  ;;  %2165 = vmatprep.mubr.msk.bf16.mxu0 %vm342_vm2, %v709_v24 }
 0x12c   : > { %2218 = vmatpush3.bf16.msra.mxu1 %v2328_v62  ;;  %2213 = vmatprep.mubr.msk.bf16.mxu1 %vm342_vm2, %v1165_v25 }
 0x12d   : > { %2219 = vmatprep.subr.bf16.mxu1 %v2329_v23 }
 0x130   : > { %2220 = vmatpush3.bf16.msra.mxu1 %v2329_v23 }
 0x132   : > { %2166 = vmatmul.mubr.msk.bf16.gmra.mrb[12].mxu0 %vm342_vm2, %v710_v30 }
 0x133   : > { %2214 = vmatmul.mubr.msk.bf16.gmra.mrb[4].mxu1 %vm342_vm2, %v1166_v31 }
 0x134   : > { %2221 = vmatprep.mubr.msk.bf16.mxu1 %vm342_vm2, %v1277_v32 }
 0x13b   : > { %2222 = vmatmul.mubr.msk.bf16.vlgmr.msra.gmra.mrb[0].mxu1 %vm342_vm2, %v1278_v33 }
 0x13c   : > { %2225 = vmatprep.mubr.msk.bf16.mxu1 %vm342_vm2, %v1279_v34 }
 0x143   : > { %2226 = vmatmul.mubr.msk.bf16.gmra.mrb[4].mxu1 %vm342_vm2, %v1280_v36 }
 0x1fd   : > { %v2163_v49 = vpop.f32.mrb[8].mxu0 }
 0x1fe   : > { %v774_v51 = vpop.f32.mrb[9].mxu0  ;;  %v2229_v44 = vadd.f32 %v2163_v49, %v2521_v2 }
 0x1ff   : > { %v2164_v37 = vpop.f32.mrb[10].mxu0  ;;  %v2231_v46 = vadd.f32 %v2521_v2, %v774_v51 }
 0x200   : > { %v777_v38 = vpop.f32.mrb[11].mxu0  ;;  %v2233_v50 = vadd.f32 %v2164_v37, %v2521_v2 }
 0x201   : > { %v2235_v54 = vadd.f32 %v2521_v2, %v777_v38 }
 0x205   : > { %v2167_v47 = vpop.f32.mrb[12].mxu0 }
 0x206   : > { %v790_v61 = vpop.f32.mrb[13].mxu0  ;;  %v2530_v55 = vadd.f32 %v2167_v47, %v2521_v2 }
 0x207   : > { %v2168_v42 = vpop.f32.mrb[14].mxu0  ;;  %v2533_v58 = vadd.f32 %v2521_v2, %v790_v61 }
 0x208   : > { %v2516_v4 = vpop.f32.mrb[15].mxu0  ;;  %v2539_v0 = vadd.f32 %v2168_v42, %v2521_v2 }
 0x20e   : > { %v2223_v48 = vpop.f32.mrb[0].mxu1 }
 0x20f   : > { %v2230_v52 = vadd.f32 %v2229_v44, %v2223_v48  ;;  %v1344_v53 = vpop.f32.mrb[1].mxu1 }
 0x210   : > { %v2232_v56 = vadd.f32 %v2231_v46, %v1344_v53  ;;  %v2224_v57 = vpop.f32.mrb[2].mxu1 }
 0x211   : > { %v1425_v59 = vcombine.high %v2230_v52, %v2230_v52  ;;  %v1432_v60 = vrot.slane %v2230_v52, %v2524_v45  ;;  %v2536_v62 = vadd.f32 %v2233_v50, %v2224_v57  ;;  %v1347_v63 = vpop.f32.mrb[3].mxu1 }
 0x212   : > { %v1391_v1 = vcombine.high %v2232_v56, %v2232_v56  ;;  %v1398_v3 = vrot.slane %v2232_v56, %v2524_v45  ;;  %v2542_v5 = vadd.f32 %v2235_v54, %v1347_v63 }
 0x213   : > { %v1439_v7 = vrot.slane %v1425_v59, %v2524_v45  ;;  %v1440_v8 = vcombine.high %v1432_v60, %v1432_v60  ;;  %v1616_v9 = vsel %vm1559_vm3, %v1432_v60, -inf  ;;  %v1442_v10 = vcombine.high %v2536_v62, %v2536_v62 }
 0x214   : > { %v1617_v11 = vrot.slane %v1616_v9, 4  ;;  %v1405_v12 = vrot.slane %v1391_v1, %v2524_v45  ;;  %v1406_v13 = vcombine.high %v1398_v3, %v1398_v3  ;;  %v1560_v14 = vsel %vm1559_vm3, %v1398_v3, -inf }
 0x215   : > { %v1441_v15 = vcombine.high %v1439_v7, %v1439_v7  ;;  %v1623_v16 = vsel %vm1559_vm3, %v1440_v8, -inf  ;;  %v1630_v17 = vsel %vm1559_vm3, %v1439_v7, -inf  ;;  %v1561_v18 = vrot.slane %v1560_v14, 4 }
 0x216   : > { %v1618_v19 = vmax.f32 %v1616_v9, %v1617_v11  ;;  %v1624_v20 = vrot.slane %v1623_v16, 4  ;;  %v1631_v21 = vrot.slane %v1630_v17, 4  ;;  %v1407_v22 = vcombine.high %v1405_v12, %v1405_v12  ;;  %v2552_v23 = vpop.f32.mrb[4].mxu1 }
 0x217   : > { %v1637_v24 = vsel %vm1559_vm3, %v1441_v15, -inf  ;;  %v1562_v25 = vmax.f32 %v1560_v14, %v1561_v18  ;;  %v1567_v26 = vsel %vm1559_vm3, %v1406_v13, -inf  ;;  %v1574_v27 = vsel %vm1559_vm3, %v1405_v12, -inf  ;;  %v2557_v28 = vpop.f32.mrb[5].mxu1 }
 0x218   : > { %v1619_v29 = vrot.slane %v1618_v19, 2  ;;  %v1625_v30 = vmax.f32 %v1623_v16, %v1624_v20  ;;  %v1632_v31 = vmax.f32 %v1630_v17, %v1631_v21  ;;  %v1638_v32 = vrot.slane %v1637_v24, 4  ;;  %v2559_v33 = vpop.f32.mrb[6].mxu1 }
 0x219   : > { %v1563_v34 = vrot.slane %v1562_v25, 2  ;;  %v1568_v35 = vrot.slane %v1567_v26, 4  ;;  %v1575_v36 = vrot.slane %v1574_v27, 4  ;;  %v1581_v49 = vsel %vm1559_vm3, %v1407_v22, -inf  ;;  %v2562_v51 = vpop.f32.mrb[7].mxu1 }
 0x21a   : > { %v1620_v37 = vmax.f32 %v1618_v19, %v1619_v29  ;;  %v1626_v38 = vrot.slane %v1625_v30, 2  ;;  %v1633_v39 = vrot.slane %v1632_v31, 2  ;;  %v1639_v40 = vmax.f32 %v1637_v24, %v1638_v32 }
 0x21b   : > { %v1564_v41 = vmax.f32 %v1562_v25, %v1563_v34  ;;  %v1569_v47 = vmax.f32 %v1567_v26, %v1568_v35  ;;  %v1576_v61 = vmax.f32 %v1574_v27, %v1575_v36  ;;  %v1582_v42 = vrot.slane %v1581_v49, 4 }
 0x21c   : > { %v1621_v6 = vrot.slane %v1620_v37, 1  ;;  %v1627_v43 = vmax.f32 %v1625_v30, %v1626_v38  ;;  %v1634_v44 = vmax.f32 %v1632_v31, %v1633_v39  ;;  %v1640_v46 = vrot.slane %v1639_v40, 2 }
 0x21d   : > { %v1565_v48 = vrot.slane %v1564_v41, 1  ;;  %v1570_v50 = vrot.slane %v1569_v47, 2  ;;  %v1577_v52 = vrot.slane %v1576_v61, 2  ;;  %v1583_v53 = vmax.f32 %v1581_v49, %v1582_v42 }
 0x21e   : > { %v1622_v54 = vmax.f32 %v1620_v37, %v1621_v6  ;;  %v1628_v56 = vrot.slane %v1627_v43, 1  ;;  %v1635_v57 = vrot.slane %v1634_v44, 1  ;;  %v1641_v59 = vmax.f32 %v1639_v40, %v1640_v46 }
 0x21f   : > { %v1566_v60 = vmax.f32 %v1564_v41, %v1565_v48  ;;  %v1571_v63 = vmax.f32 %v1569_v47, %v1570_v50  ;;  %v1578_v1 = vmax.f32 %v1576_v61, %v1577_v52  ;;  %v1584_v3 = vrot.slane %v1583_v53, 2 }
 0x220   : > { %v1629_v7 = vmax.f32 %v1627_v43, %v1628_v56  ;;  %v1636_v8 = vmax.f32 %v1634_v44, %v1635_v57  ;;  %v1642_v9 = vrot.slane %v1641_v59, 1  ;;  %v1792_v11 = vmax.f32 %v1622_v54, 0.0 }
 0x221   : > { %v1572_v12 = vrot.slane %v1571_v63, 1  ;;  %v1579_v13 = vrot.slane %v1578_v1, 1  ;;  %v1585_v14 = vmax.f32 %v1583_v53, %v1584_v3  ;;  %v1784_v15 = vmax.f32 %v1566_v60, 0.0 }
 0x222   : > { %v1643_v16 = vmax.f32 %v1641_v59, %v1642_v9  ;;  %v1793_v17 = vmax.f32 %v1629_v7, 0.0  ;;  %v1794_v18 = vmax.f32 %v1636_v8, 0.0  ;;  %v1449_v19 = vrot.slane %v2536_v62, %v2524_v45 }
 0x223   : > { %v1573_v20 = vmax.f32 %v1571_v63, %v1572_v12  ;;  %v1580_v21 = vmax.f32 %v1578_v1, %v1579_v13  ;;  %v1586_v22 = vrot.slane %v1585_v14, 1  ;;  %v1456_v24 = vrot.slane %v1442_v10, %v2524_v45 }
 0x224   : > { %v1795_v25 = vmax.f32 %v1643_v16, 0.0  ;;  %v1862_v26 = vsel %vm1848_vm4, %v1793_v17, %v1792_v11  ;;  %v1457_v27 = vcombine.high %v1449_v19, %v1449_v19  ;;  %v1644_v29 = vsel %vm1559_vm3, %v1449_v19, -inf }
 0x225   : > { %v1863_v30 = vsel %vm1850_vm5, %v1794_v18, %v1862_v26  ;;  %v1587_v31 = vmax.f32 %v1585_v14, %v1586_v22  ;;  %v1785_v32 = vmax.f32 %v1573_v20, 0.0  ;;  %v1786_v34 = vmax.f32 %v1580_v21, 0.0 }
 0x226   : > { %v1458_v35 = vcombine.high %v1456_v24, %v1456_v24  ;;  %v1645_v36 = vrot.slane %v1644_v29, 4  ;;  %v1651_v49 = vsel %vm1559_vm3, %v1457_v27, -inf  ;;  %v1658_v37 = vsel %vm1559_vm3, %v1456_v24, -inf }
 0x227   : > { %v1787_v38 = vmax.f32 %v1587_v31, 0.0  ;;  %v1849_v62 = vsel %vm1848_vm4, %v1785_v32, %v1784_v15  ;;  %v1652_v10 = vrot.slane %v1651_v49, 4  ;;  %v1659_v39 = vrot.slane %v1658_v37, 4 }
 0x228   : > { %v1851_v40 = vsel %vm1850_vm5, %v1786_v34, %v1849_v62  ;;  %v1646_v41 = vmax.f32 %v1644_v29, %v1645_v36  ;;  %v1665_v47 = vsel %vm1559_vm3, %v1458_v35, -inf  ;;  %v1864_v61 = vsel %vm1852_vm6, %v1795_v25, %v1863_v30 }
 0x229   : > { %v1653_v42 = vmax.f32 %v1651_v49, %v1652_v10  ;;  %v1660_v6 = vmax.f32 %v1658_v37, %v1659_v39  ;;  %v1666_v43 = vrot.slane %v1665_v47, 4  ;;  %v1408_v44 = vcombine.high %v2542_v5, %v2542_v5 }
 0x22a   : > { %v1647_v46 = vrot.slane %v1646_v41, 2  ;;  %v1415_v48 = vrot.slane %v2542_v5, %v2524_v45  ;;  %v2584_v50 = vsel %vm1852_vm6, %v1787_v38, %v1851_v40  ;;  %v2238_v52 = vadd.f32 %v2530_v55, %v2552_v23 }
 0x22b   : > { %v1654_v53 = vrot.slane %v1653_v42, 2  ;;  %v1661_v54 = vrot.slane %v1660_v6, 2  ;;  %v1667_v56 = vmax.f32 %v1665_v47, %v1666_v43  ;;  %v1422_v57 = vrot.slane %v1408_v44, %v2524_v45 }
 0x22c   : > { %v1648_v59 = vmax.f32 %v1646_v41, %v1647_v46  ;;  %v1423_v60 = vcombine.high %v1415_v48, %v1415_v48  ;;  %v1588_v63 = vsel %vm1559_vm3, %v1415_v48, -inf  ;;  %v1493_v1 = vcombine.high %v2238_v52, %v2238_v52 }
 0x22d   : > { %v1655_v3 = vmax.f32 %v1653_v42, %v1654_v53  ;;  %v1662_v5 = vmax.f32 %v1660_v6, %v1661_v54  ;;  %v1668_v7 = vrot.slane %v1667_v56, 2  ;;  %v1424_v8 = vcombine.high %v1422_v57, %v1422_v57 }
 0x22e   : > { %v1649_v9 = vrot.slane %v1648_v59, 1  ;;  %v1589_v11 = vrot.slane %v1588_v63, 4  ;;  %v1595_v55 = vsel %vm1559_vm3, %v1423_v60, -inf  ;;  %v1602_v23 = vsel %vm1559_vm3, %v1422_v57, -inf }
 0x22f   : > { %v1656_v12 = vrot.slane %v1655_v3, 1  ;;  %v1663_v13 = vrot.slane %v1662_v5, 1  ;;  %v1669_v14 = vmax.f32 %v1667_v56, %v1668_v7  ;;  %v1596_v15 = vrot.slane %v1595_v55, 4 }
 0x230   : > { %v1650_v16 = vmax.f32 %v1648_v59, %v1649_v9  ;;  %v1590_v17 = vmax.f32 %v1588_v63, %v1589_v11  ;;  %v1603_v18 = vrot.slane %v1602_v23, 4  ;;  %v1609_v19 = vsel %vm1559_vm3, %v1424_v8, -inf }
 0x231   : > { %v1657_v20 = vmax.f32 %v1655_v3, %v1656_v12  ;;  %v1664_v21 = vmax.f32 %v1662_v5, %v1663_v13  ;;  %v1670_v22 = vrot.slane %v1669_v14, 1  ;;  %v1597_v24 = vmax.f32 %v1595_v55, %v1596_v15 }
 0x232   : > { %v1796_v25 = vmax.f32 %v1650_v16, 0.0  ;;  %v1591_v26 = vrot.slane %v1590_v17, 2  ;;  %v1604_v27 = vmax.f32 %v1602_v23, %v1603_v18  ;;  %v1610_v29 = vrot.slane %v1609_v19, 4 }
 0x233   : > { %v1671_v30 = vmax.f32 %v1669_v14, %v1670_v22  ;;  %v1797_v31 = vmax.f32 %v1657_v20, 0.0  ;;  %v1798_v32 = vmax.f32 %v1664_v21, 0.0  ;;  %v1598_v34 = vrot.slane %v1597_v24, 2 }
 0x234   : > { %v1865_v35 = vsel %vm1854_vm7, %v1796_v25, %v1864_v61  ;;  %v1592_v36 = vmax.f32 %v1590_v17, %v1591_v26  ;;  %v1605_v49 = vrot.slane %v1604_v27, 2  ;;  %v1611_v37 = vmax.f32 %v1609_v19, %v1610_v29 }
 0x235   : > { %v1799_v38 = vmax.f32 %v1671_v30, 0.0  ;;  %v1866_v62 = vsel %vm1856_vm8, %v1797_v31, %v1865_v35  ;;  %v1599_v10 = vmax.f32 %v1597_v24, %v1598_v34  ;;  %v1500_v39 = vrot.slane %v2238_v52, %v2524_v45 }
 0x236   : > { %v1867_v40 = vsel %vm1858_vm9, %v1798_v32, %v1866_v62  ;;  %v1593_v41 = vrot.slane %v1592_v36, 1  ;;  %v1606_v47 = vmax.f32 %v1604_v27, %v1605_v49  ;;  %v1612_v61 = vrot.slane %v1611_v37, 2 }
 0x237   : > { %v1868_v42 = vsel %vm1860_vm10, %v1799_v38, %v1867_v40  ;;  %v1600_v6 = vrot.slane %v1599_v10, 1  ;;  %v1507_v43 = vrot.slane %v1493_v1, %v2524_v45  ;;  %v1508_v44 = vcombine.high %v1500_v39, %v1500_v39 }
 0x238   : > { %1888 = vst.msk [vmem:[%s2598_s23 + $0x8] sm:$0xff] %vm342_vm2, %v1868_v42  ;;  %v1594_v46 = vmax.f32 %v1592_v36, %v1593_v41  ;;  %v1607_v48 = vrot.slane %v1606_v47, 1  ;;  %v1613_v53 = vmax.f32 %v1611_v37, %v1612_v61  ;;  %v1728_v54 = vsel %vm1559_vm3, %v1500_v39, -inf }
 0x239   : > { %v1601_v56 = vmax.f32 %v1599_v10, %v1600_v6  ;;  %v1509_v52 = vcombine.high %v1507_v43, %v1507_v43  ;;  %v1729_v57 = vrot.slane %v1728_v54, 4  ;;  %v1735_v59 = vsel %vm1559_vm3, %v1508_v44, -inf }
 0x23a   : > { %v1608_v60 = vmax.f32 %v1606_v47, %v1607_v48  ;;  %v1614_v63 = vrot.slane %v1613_v53, 1  ;;  %v1788_v3 = vmax.f32 %v1594_v46, 0.0  ;;  %v1736_v5 = vrot.slane %v1735_v59, 4 }
 0x23b   : > { %v1789_v7 = vmax.f32 %v1601_v56, 0.0  ;;  %v1730_v8 = vmax.f32 %v1728_v54, %v1729_v57  ;;  %v1742_v1 = vsel %vm1559_vm3, %v1507_v43, -inf  ;;  %v1749_v9 = vsel %vm1559_vm3, %v1509_v52, -inf }
 0x23c   : > { %v1615_v11 = vmax.f32 %v1613_v53, %v1614_v63  ;;  %v1790_v55 = vmax.f32 %v1608_v60, 0.0  ;;  %v1855_v23 = vsel %vm1854_vm7, %v1788_v3, %v2584_v50  ;;  %v1737_v12 = vmax.f32 %v1735_v59, %v1736_v5 }
 0x23d   : > { %v1857_v13 = vsel %vm1856_vm8, %v1789_v7, %v1855_v23  ;;  %v1731_v14 = vrot.slane %v1730_v8, 2  ;;  %v1743_v15 = vrot.slane %v1742_v1, 4  ;;  %v1750_v16 = vrot.slane %v1749_v9, 4 }
 0x23e   : > { %v1791_v17 = vmax.f32 %v1615_v11, 0.0  ;;  %v1859_v18 = vsel %vm1858_vm9, %v1790_v55, %v1857_v13  ;;  %v1738_v19 = vrot.slane %v1737_v12, 2  ;;  %v2240_v20 = vadd.f32 %v2533_v58, %v2557_v28 }
 0x23f   : > { %v1732_v21 = vmax.f32 %v1730_v8, %v1731_v14  ;;  %v1744_v22 = vmax.f32 %v1742_v1, %v1743_v15  ;;  %v1751_v24 = vmax.f32 %v1749_v9, %v1750_v16  ;;  %v2242_v50 = vadd.f32 %v2539_v0, %v2559_v33 }
 0x240   : > { %v1861_v25 = vsel %vm1860_vm10, %v1791_v17, %v1859_v18  ;;  %v1739_v26 = vmax.f32 %v1737_v12, %v1738_v19  ;;  %v1459_v27 = vcombine.high %v2240_v20, %v2240_v20  ;;  %v1466_v29 = vrot.slane %v2240_v20, %v2524_v45 }
 0x241   : > { %1887 = vst.msk [vmem:[%s2598_s23] sm:$0xff] %vm342_vm2, %v1861_v25  ;;  %v1745_v30 = vrot.slane %v1744_v22, 2  ;;  %v1752_v31 = vrot.slane %v1751_v24, 2  ;;  %v1733_v49 = vrot.slane %v1732_v21, 1  ;;  %v1510_v47 = vcombine.high %v2242_v50, %v2242_v50 }
 0x242   : > { %v1473_v32 = vrot.slane %v1459_v27, %v2524_v45  ;;  %v1474_v34 = vcombine.high %v1466_v29, %v1466_v29  ;;  %v1672_v58 = vsel %vm1559_vm3, %v1466_v29, -inf  ;;  %v1740_v28 = vrot.slane %v1739_v26, 1 }
 0x243   : > { %v1746_v35 = vmax.f32 %v1744_v22, %v1745_v30  ;;  %v1673_v36 = vrot.slane %v1672_v58, 4  ;;  %v1753_v62 = vmax.f32 %v1751_v24, %v1752_v31  ;;  %v1734_v43 = vmax.f32 %v1732_v21, %v1733_v49 }
 0x244   : > { %v1475_v0 = vcombine.high %v1473_v32, %v1473_v32  ;;  %v1679_v33 = vsel %vm1559_vm3, %v1474_v34, -inf  ;;  %v1686_v37 = vsel %vm1559_vm3, %v1473_v32, -inf  ;;  %v1741_v61 = vmax.f32 %v1739_v26, %v1740_v28 }
 0x245   : > { %v1747_v38 = vrot.slane %v1746_v35, 1  ;;  %v1674_v10 = vmax.f32 %v1672_v58, %v1673_v36  ;;  %v1680_v39 = vrot.slane %v1679_v33, 4  ;;  %v1687_v40 = vrot.slane %v1686_v37, 4 }
 0x246   : > { %v1693_v41 = vsel %vm1559_vm3, %v1475_v0, -inf  ;;  %v1517_v48 = vrot.slane %v2242_v50, %v2524_v45  ;;  %v1754_v54 = vrot.slane %v1753_v62, 1  ;;  %v1524_v60 = vrot.slane %v1510_v47, %v2524_v45 }
 0x247   : > { %v1675_v42 = vrot.slane %v1674_v10, 2  ;;  %v1694_v6 = vrot.slane %v1693_v41, 4  ;;  %v1681_v44 = vmax.f32 %v1679_v33, %v1680_v39  ;;  %v1688_v46 = vmax.f32 %v1686_v37, %v1687_v40 }
 0x248   : > { %v1748_v53 = vmax.f32 %v1746_v35, %v1747_v38  ;;  %v1525_v63 = vcombine.high %v1517_v48, %v1517_v48  ;;  %v1809_v3 = vmax.f32 %v1741_v61, 0.0  ;;  %v1756_v8 = vsel %vm1559_vm3, %v1517_v48, -inf }
 0x249   : > { %v1676_v56 = vmax.f32 %v1674_v10, %v1675_v42  ;;  %v1695_v52 = vmax.f32 %v1693_v41, %v1694_v6  ;;  %v1682_v57 = vrot.slane %v1681_v44, 2  ;;  %v1689_v59 = vrot.slane %v1688_v46, 2 }
 0x24a   : > { %v1526_v11 = vcombine.high %v1524_v60, %v1524_v60  ;;  %v1757_v55 = vrot.slane %v1756_v8, 4  ;;  %v1808_v23 = vmax.f32 %v1734_v43, 0.0  ;;  %v1763_v13 = vsel %vm1559_vm3, %v1525_v63, -inf }
 0x24b   : > { %v1677_v5 = vrot.slane %v1676_v56, 1  ;;  %v1696_v7 = vrot.slane %v1695_v52, 2  ;;  %v1683_v1 = vmax.f32 %v1681_v44, %v1682_v57  ;;  %v1690_v9 = vmax.f32 %v1688_v46, %v1689_v59 }
 0x24c   : > { %v1770_v14 = vsel %vm1559_vm3, %v1524_v60, -inf  ;;  %v1755_v15 = vmax.f32 %v1753_v62, %v1754_v54  ;;  %v1810_v16 = vmax.f32 %v1748_v53, 0.0  ;;  %v1758_v17 = vmax.f32 %v1756_v8, %v1757_v55 }
 0x24d   : > { %v1697_v12 = vmax.f32 %v1695_v52, %v1696_v7  ;;  %v1764_v18 = vrot.slane %v1763_v13, 4  ;;  %v1876_v19 = vsel %vm1848_vm4, %v1809_v3, %v1808_v23  ;;  %v1684_v20 = vrot.slane %v1683_v1, 1 }
 0x24e   : > { %v1771_v21 = vrot.slane %v1770_v14, 4  ;;  %v1777_v22 = vsel %vm1559_vm3, %v1526_v11, -inf  ;;  %v1678_v24 = vmax.f32 %v1676_v56, %v1677_v5  ;;  %v1691_v50 = vrot.slane %v1690_v9, 1 }
 0x24f   : > { %v1759_v25 = vrot.slane %v1758_v17, 2  ;;  %v1765_v26 = vmax.f32 %v1763_v13, %v1764_v18  ;;  %v2243_v27 = vadd.f32 %v2521_v2, %v2516_v4  ;;  %v1698_v29 = vrot.slane %v1697_v12, 1 }
 0x250   : > { %v1772_v30 = vmax.f32 %v1770_v14, %v1771_v21  ;;  %v1778_v31 = vrot.slane %v1777_v22, 4  ;;  %v1811_v32 = vmax.f32 %v1755_v15, 0.0  ;;  %v1877_v34 = vsel %vm1850_vm5, %v1810_v16, %v1876_v19 }
 0x251   : > { %v1760_v58 = vmax.f32 %v1758_v17, %v1759_v25  ;;  %v1766_v28 = vrot.slane %v1765_v26, 2  ;;  %v1685_v35 = vmax.f32 %v1683_v1, %v1684_v20  ;;  %v2244_v0 = vadd.f32 %v2243_v27, %v2562_v51 }
 0x252   : > { %v1773_v36 = vrot.slane %v1772_v30, 2  ;;  %v1779_v49 = vmax.f32 %v1777_v22, %v1778_v31  ;;  %v1692_v33 = vmax.f32 %v1690_v9, %v1691_v50  ;;  %v1800_v37 = vmax.f32 %v1678_v24, 0.0 }
 0x253   : > { %v1761_v38 = vrot.slane %v1760_v58, 1  ;;  %v1767_v62 = vmax.f32 %v1765_v26, %v1766_v28  ;;  %v1699_v10 = vmax.f32 %v1697_v12, %v1698_v29  ;;  %v1476_v2 = vcombine.high %v2244_v0, %v2244_v0 }
 0x254   : > { %v1774_v39 = vmax.f32 %v1772_v30, %v1773_v36  ;;  %v1780_v4 = vrot.slane %v1779_v49, 2  ;;  %v1878_v47 = vsel %vm1852_vm6, %v1811_v32, %v1877_v34  ;;  %v1483_v61 = vrot.slane %v2244_v0, %v2524_v45 }
 0x255   : > { %v1762_v40 = vmax.f32 %v1760_v58, %v1761_v38  ;;  %v1768_v41 = vrot.slane %v1767_v62, 1  ;;  %v1801_v42 = vmax.f32 %v1685_v35, 0.0  ;;  %v1490_v44 = vrot.slane %v1476_v2, %v2524_v45 }
 0x256   : > { %v1775_v6 = vrot.slane %v1774_v39, 1  ;;  %v1781_v43 = vmax.f32 %v1779_v49, %v1780_v4  ;;  %v1491_v48 = vcombine.high %v1483_v61, %v1483_v61  ;;  %v1700_v53 = vsel %vm1559_vm3, %v1483_v61, -inf }
 0x257   : > { %v1769_v51 = vmax.f32 %v1767_v62, %v1768_v41  ;;  %v1812_v46 = vmax.f32 %v1762_v40, 0.0  ;;  %v1492_v52 = vcombine.high %v1490_v44, %v1490_v44  ;;  %v1701_v57 = vrot.slane %v1700_v53, 4 }
 0x258   : > { %v1776_v54 = vmax.f32 %v1774_v39, %v1775_v6  ;;  %v1782_v56 = vrot.slane %v1781_v43, 1  ;;  %v1707_v63 = vsel %vm1559_vm3, %v1491_v48, -inf  ;;  %v1714_v3 = vsel %vm1559_vm3, %v1490_v44, -inf }
 0x259   : > { %v1813_v59 = vmax.f32 %v1769_v51, 0.0  ;;  %v1879_v60 = vsel %vm1854_vm7, %v1812_v46, %v1878_v47  ;;  %v1702_v8 = vmax.f32 %v1700_v53, %v1701_v57  ;;  %v1708_v45 = vrot.slane %v1707_v63, 4 }
 0x25a   : > { %v1783_v5 = vmax.f32 %v1781_v43, %v1782_v56  ;;  %v1814_v7 = vmax.f32 %v1776_v54, 0.0  ;;  %v1802_v1 = vmax.f32 %v1692_v33, 0.0  ;;  %v1715_v11 = vrot.slane %v1714_v3, 4 }
 0x25b   : > { %v1880_v9 = vsel %vm1856_vm8, %v1813_v59, %v1879_v60  ;;  %v1721_v55 = vsel %vm1559_vm3, %v1492_v52, -inf  ;;  %v1703_v13 = vrot.slane %v1702_v8, 2  ;;  %v1709_v14 = vmax.f32 %v1707_v63, %v1708_v45 }
 0x25c   : > { %v1815_v23 = vmax.f32 %v1783_v5, 0.0  ;;  %v1881_v12 = vsel %vm1858_vm9, %v1814_v7, %v1880_v9  ;;  %v1869_v15 = vsel %vm1848_vm4, %v1801_v42, %v1800_v37  ;;  %v1716_v16 = vmax.f32 %v1714_v3, %v1715_v11 }
 0x25d   : > { %v1722_v17 = vrot.slane %v1721_v55, 4  ;;  %v1704_v19 = vmax.f32 %v1702_v8, %v1703_v13  ;;  %v1710_v20 = vrot.slane %v1709_v14, 2  ;;  %v1803_v21 = vmax.f32 %v1699_v10, 0.0 }
 0x25e   : > { %v1882_v18 = vsel %vm1860_vm10, %v1815_v23, %v1881_v12  ;;  %v1717_v22 = vrot.slane %v1716_v16, 2  ;;  %v1870_v50 = vsel %vm1850_vm5, %v1802_v1, %v1869_v15 }
 0x25f   : > { %1890 = vst.msk [vmem:[%s2598_s23 + $0x18] sm:$0xff] %vm342_vm2, %v1882_v18  ;;  %v1723_v24 = vmax.f32 %v1721_v55, %v1722_v17  ;;  %v1705_v25 = vrot.slane %v1704_v19, 1  ;;  %v1711_v26 = vmax.f32 %v1709_v14, %v1710_v20  ;;  %v1871_v58 = vsel %vm1852_vm6, %v1803_v21, %v1870_v50 }
 0x260   : > { %v1718_v27 = vmax.f32 %v1716_v16, %v1717_v22 }
 0x261   : > { %v1724_v29 = vrot.slane %v1723_v24, 2  ;;  %v1706_v30 = vmax.f32 %v1704_v19, %v1705_v25  ;;  %v1712_v31 = vrot.slane %v1711_v26, 1 }
 0x262   : > { %v1719_v32 = vrot.slane %v1718_v27, 1 }
 0x263   : > { %v1725_v34 = vmax.f32 %v1723_v24, %v1724_v29  ;;  %v1713_v28 = vmax.f32 %v1711_v26, %v1712_v31  ;;  %v1804_v35 = vmax.f32 %v1706_v30, 0.0 }
 0x264   : > { %v1720_v36 = vmax.f32 %v1718_v27, %v1719_v32 }
 0x265   : > { %v1726_v49 = vrot.slane %v1725_v34, 1  ;;  %v1805_v0 = vmax.f32 %v1713_v28, 0.0  ;;  %v1872_v33 = vsel %vm1854_vm7, %v1804_v35, %v1871_v58 }
 0x266   : > { %v1806_v38 = vmax.f32 %v1720_v36, 0.0 }
 0x267   : > { %v1727_v37 = vmax.f32 %v1725_v34, %v1726_v49  ;;  %v1873_v62 = vsel %vm1856_vm8, %v1805_v0, %v1872_v33 }
 0x268   : > { %v1874_v39 = vsel %vm1858_vm9, %v1806_v38, %v1873_v62 }
 0x269   : > { %v1807_v10 = vmax.f32 %v1727_v37, 0.0 }
 0x26b   : > { %v1875_v4 = vsel %vm1860_vm10, %v1807_v10, %v1874_v39 }
 0x26c   : > { %1889 = vst.msk [vmem:[%s2598_s23 + $0x10] sm:$0xff] %vm342_vm2, %v1875_v4 }
 0x26d PF: > { %s15_s18 = sadd.s32 1, %s2336_s18  }
 0x26e   : > { %p12_p4 = scmp.ge.s32.totalorder %s15_s18, 4  }
 0x270   :  { %14 = sbr.rel (!%p12_p4) target bundleno = 1 (0x1), region = 78 }

</bundles_post_ra>
